<compile_context>
chip_gen: v5e
topology: v5e:2x2
jax: 0.10.0
libtpu: 0.0.40
codegen_flags: <defaults>
</compile_context>

<pallas_src>
import functools

import jax
import jax.numpy as jnp
from jax import lax
from jax.experimental import pallas as pl
from jax.experimental.pallas import tpu as pltpu


def _batch_ensemble_kernel(x_ref, w_ref, alpha_ref, gamma_ref, ebias_ref, o_ref,
                           *, E, B):
    """One grid step = one N-tile (tn output features) for ALL ensemble members.

    x_ref:     (B, D1)    full input, resident (invariant index_map)
    w_ref:     (tn, D1)   weight tile, rows = output features (no host transpose)
    alpha_ref: (E, D1)    full, resident
    gamma_ref: (E, tn)    per-tile slab
    ebias_ref: (E, tn)    per-tile slab
    o_ref:     (E*B, tn)  lane-dense output tile, rows ordered e*B + b
    """
    x = x_ref[...]                      # (B, D1)
    alpha = alpha_ref[...]              # (E, D1)
    D1 = x.shape[1]
    tn = o_ref.shape[1]

    # Fold the ensemble axis into the matmul M dimension:
    #   rx[e*B + b, :] = x[b, :] * alpha[e, :]
    rx = (alpha[:, None, :] * x[None, :, :]).reshape(E * B, D1)

    # (E*B, D1) . (tn, D1)^T -> (E*B, tn); contraction on weight's LAST dim so
    # the (D2, D1) weight is streamed as-is. f32 accumulation on the MXU.
    wrx = lax.dot_general(
        rx, w_ref[...],
        dimension_numbers=(((1,), (1,)), ((), ())),
        preferred_element_type=jnp.float32)

    # Per-ensemble epilogue in f32: gamma * wrx + ensemble_bias.
    gamma = gamma_ref[...].astype(jnp.float32)[:, None, :]   # (E, 1, tn)
    ebias = ebias_ref[...].astype(jnp.float32)[:, None, :]   # (E, 1, tn)
    out = wrx.reshape(E, B, tn) * gamma + ebias               # (E, B, tn)
    o_ref[...] = out.reshape(E * B, tn).astype(o_ref.dtype)


def _pick_block_d2(D2, D1, itemsize):
    """Largest N-tile (multiple of 128, or the full D2) whose double-buffered
    (tn, D1) weight slab stays ~<= 8 MiB, comfortably under default scoped VMEM
    on v5e/v6e/v7x."""
    budget = 8 * 1024 * 1024
    max_tn = max(128, (budget // (2 * D1 * itemsize)) // 128 * 128)
    return D2 if D2 <= max_tn else max_tn


def batch_ensemble_forward(x, weight, alpha_be, gamma_be, ensemble_bias,
                           *, block_d2=None):
    """x: (B, D1); weight: (D2, D1); alpha: (E, D1); gamma/ebias: (E, D2).
    Returns (E*B, D2) with row ordering e*B + b (matches the PyTorch module)."""
    B, D1 = x.shape
    D2, D1w = weight.shape
    assert D1w == D1
    E = alpha_be.shape[0]

    itemsize = jnp.dtype(weight.dtype).itemsize
    if block_d2 is None:
        block_d2 = _pick_block_d2(D2, D1, itemsize)
    tn = min(block_d2, D2)
    grid_n = pl.cdiv(D2, tn)

    flops = 2 * E * B * D1 * D2 + 3 * E * B * D2 + E * B * D1
    bytes_accessed = (
        (x.size + weight.size + alpha_be.size + gamma_be.size + ensemble_bias.size)
        * itemsize
        + E * B * D2 * jnp.dtype(x.dtype).itemsize)

    kernel = functools.partial(_batch_ensemble_kernel, E=E, B=B)

    out = pl.pallas_call(
        kernel,
        out_shape=jax.ShapeDtypeStruct((E * B, D2), x.dtype),
        grid_spec=pltpu.PrefetchScalarGridSpec(
            num_scalar_prefetch=0,
            grid=(grid_n,),
            in_specs=[
                pl.BlockSpec((B, D1), lambda n: (0, 0)),    # x (invariant)
                pl.BlockSpec((tn, D1), lambda n: (n, 0)),   # weight N-tile (streamed)
                pl.BlockSpec((E, D1), lambda n: (0, 0)),    # alpha_be (invariant)
                pl.BlockSpec((E, tn), lambda n: (0, n)),    # gamma_be tile
                pl.BlockSpec((E, tn), lambda n: (0, n)),    # ensemble_bias tile
            ],
            out_specs=pl.BlockSpec((E * B, tn), lambda n: (0, n)),
        ),
        compiler_params=pltpu.CompilerParams(
            dimension_semantics=("parallel",)),
        cost_estimate=pl.CostEstimate(
            flops=flops, transcendentals=0, bytes_accessed=bytes_accessed),
    )(x, weight, alpha_be, gamma_be, ensemble_bias)

    return out


def reference_forward(x, weight, alpha_be, gamma_be, ensemble_bias):
    """Pure-JAX reference mirroring the PyTorch module line-by-line."""
    E = alpha_be.shape[0]
    B, D1 = x.shape
    r_x = jnp.broadcast_to(x[None], (E, B, D1))
    r_x = r_x * alpha_be[:, None, :]
    r_x = r_x.reshape(-1, D1)
    w_r_x = r_x @ weight.T                     # bias is None in the module
    D2 = w_r_x.shape[1]
    s = w_r_x.reshape(E, -1, D2)
    s = s * gamma_be[:, None, :]
    s = s + ensemble_bias[:, None, :]
    return s.reshape(-1, D2)


if __name__ == "__main__":
    # Module config (init_mode='normal' -> N(0, 1); ensemble_bias -> zeros)
    indim, outdim, ensemble_size = 128, 256, 4
    B = 8

    key = jax.random.PRNGKey(0)
    kx, kw, ka, kg = jax.random.split(key, 4)

    x = jax.random.normal(kx, (B, indim), dtype=jnp.float32)
    weight = jax.random.normal(kw, (outdim, indim), dtype=jnp.float32)
    alpha_be = jax.random.normal(ka, (ensemble_size, indim), dtype=jnp.float32)
    gamma_be = jax.random.normal(kg, (ensemble_size, outdim), dtype=jnp.float32)
    ensemble_bias = jnp.zeros((ensemble_size, outdim), dtype=jnp.float32)

    ref = reference_forward(x, weight, alpha_be, gamma_be, ensemble_bias)

    # Default path: full-width lane-dense output tile (grid of 1).
    out = jax.block_until_ready(
        batch_ensemble_forward(x, weight, alpha_be, gamma_be, ensemble_bias))
    assert out.shape == (ensemble_size * B, outdim), out.shape
    assert jnp.allclose(out, ref, atol=1e-3, rtol=1e-3), "mismatch (single tile)"

    # N-tiled path: exercises the streamed-weight pipeline (grid of 2).
    out_tiled = jax.block_until_ready(
        batch_ensemble_forward(x, weight, alpha_be, gamma_be, ensemble_bias,
                               block_d2=128))
    assert jnp.allclose(out_tiled, ref, atol=1e-3, rtol=1e-3), "mismatch (tiled)"

    print("KERNEL_OK")
</pallas_src>

<mosaic_0001>
module attributes {stable_mosaic.version = 11 : i64} {
  func.func @_batch_ensemble_kernel(%arg0: i32, %arg1: memref<8x128xf32, #tpu.memory_space<vmem>>, %arg2: memref<256x128xf32, #tpu.memory_space<vmem>>, %arg3: memref<4x128xf32, #tpu.memory_space<vmem>>, %arg4: memref<4x256xf32, #tpu.memory_space<vmem>>, %arg5: memref<4x256xf32, #tpu.memory_space<vmem>>, %arg6: memref<32x256xf32, #tpu.memory_space<vmem>>) attributes {dimension_semantics = [#tpu.dimension_semantics<parallel>], iteration_bounds = array<i64: 1>, scalar_prefetch = 0 : i64, scratch_operands = 0 : i64, tpu.core_type = #tpu.core_type<tc>, window_params = [{pipeline_mode = #tpu.pipeline_mode<synchronous>, transform_indices = @transform_0, window_bounds = array<i64: 8, 128>}, {transform_indices = @transform_1, window_bounds = array<i64: 256, 128>}, {pipeline_mode = #tpu.pipeline_mode<synchronous>, transform_indices = @transform_2, window_bounds = array<i64: 4, 128>}, {transform_indices = @transform_3, window_bounds = array<i64: 4, 256>}, {transform_indices = @transform_4, window_bounds = array<i64: 4, 256>}, {transform_indices = @transform_5, window_bounds = array<i64: 32, 256>}]} {
    %c0 = arith.constant 0 : index
    %c0_0 = arith.constant 0 : index
    %0 = vector.load %arg1[%c0, %c0_0] : memref<8x128xf32, #tpu.memory_space<vmem>>, vector<8x128xf32>
    %c0_1 = arith.constant 0 : index
    %c0_2 = arith.constant 0 : index
    %1 = vector.load %arg3[%c0_1, %c0_2] : memref<4x128xf32, #tpu.memory_space<vmem>>, vector<4x128xf32>
    %2 = vector.shape_cast %1 : vector<4x128xf32> to vector<4x1x128xf32>
    %3 = vector.shape_cast %0 : vector<8x128xf32> to vector<1x8x128xf32>
    %4 = vector.broadcast %2 : vector<4x1x128xf32> to vector<4x8x128xf32>
    %5 = vector.broadcast %3 : vector<1x8x128xf32> to vector<4x8x128xf32>
    %6 = arith.mulf %4, %5 : vector<4x8x128xf32>
    %7 = vector.shape_cast %6 : vector<4x8x128xf32> to vector<32x128xf32>
    %c0_3 = arith.constant 0 : index
    %c0_4 = arith.constant 0 : index
    %8 = vector.load %arg2[%c0_3, %c0_4] : memref<256x128xf32, #tpu.memory_space<vmem>>, vector<256x128xf32>
    %cst = arith.constant dense<0.000000e+00> : vector<32x256xf32>
    %9 = tpu.matmul %7, %8, %cst {dimension_numbers = #tpu.dot_dimension_numbers<[1], [1], [0], [0], [0, 0, 1, 0], [], []>} : vector<32x128xf32>, vector<256x128xf32>, vector<32x256xf32> -> vector<32x256xf32>
    %c0_5 = arith.constant 0 : index
    %c0_6 = arith.constant 0 : index
    %10 = vector.load %arg4[%c0_5, %c0_6] : memref<4x256xf32, #tpu.memory_space<vmem>>, vector<4x256xf32>
    %11 = vector.shape_cast %10 : vector<4x256xf32> to vector<4x1x256xf32>
    %c0_7 = arith.constant 0 : index
    %c0_8 = arith.constant 0 : index
    %12 = vector.load %arg5[%c0_7, %c0_8] : memref<4x256xf32, #tpu.memory_space<vmem>>, vector<4x256xf32>
    %13 = vector.shape_cast %12 : vector<4x256xf32> to vector<4x1x256xf32>
    %14 = vector.shape_cast %9 : vector<32x256xf32> to vector<4x8x256xf32>
    %15 = vector.broadcast %11 : vector<4x1x256xf32> to vector<4x8x256xf32>
    %16 = arith.mulf %14, %15 : vector<4x8x256xf32>
    %17 = vector.broadcast %13 : vector<4x1x256xf32> to vector<4x8x256xf32>
    %18 = arith.addf %16, %17 : vector<4x8x256xf32>
    %19 = vector.shape_cast %18 : vector<4x8x256xf32> to vector<32x256xf32>
    %c0_9 = arith.constant 0 : index
    %c0_10 = arith.constant 0 : index
    %20 = vector.load %arg6[%c0_9, %c0_10] : memref<32x256xf32, #tpu.memory_space<vmem>>, vector<32x256xf32>
    tpu.vector_store %arg6[%c0_9, %c0_10], %19 {strides = array<i32>} : memref<32x256xf32, #tpu.memory_space<vmem>>, vector<32x256xf32>,
    return
  }
  func.func @transform_0(%arg0: i32) -> (i32, i32) {
    %c0_i32 = arith.constant 0 : i32
    %c0_i32_0 = arith.constant 0 : i32
    %c0_i32_1 = arith.constant 0 : i32
    return %c0_i32, %c0_i32_0 : i32, i32
  }
  func.func @transform_1(%arg0: i32) -> (i32, i32) {
    %c0_i32 = arith.constant 0 : i32
    %c0_i32_0 = arith.constant 0 : i32
    return %arg0, %c0_i32 : i32, i32
  }
  func.func @transform_2(%arg0: i32) -> (i32, i32) {
    %c0_i32 = arith.constant 0 : i32
    %c0_i32_0 = arith.constant 0 : i32
    %c0_i32_1 = arith.constant 0 : i32
    return %c0_i32, %c0_i32_0 : i32, i32
  }
  func.func @transform_3(%arg0: i32) -> (i32, i32) {
    %c0_i32 = arith.constant 0 : i32
    %c0_i32_0 = arith.constant 0 : i32
    return %c0_i32, %arg0 : i32, i32
  }
  func.func @transform_4(%arg0: i32) -> (i32, i32) {
    %c0_i32 = arith.constant 0 : i32
    %c0_i32_0 = arith.constant 0 : i32
    return %c0_i32, %arg0 : i32, i32
  }
  func.func @transform_5(%arg0: i32) -> (i32, i32) {
    %c0_i32 = arith.constant 0 : i32
    %c0_i32_0 = arith.constant 0 : i32
    return %c0_i32, %arg0 : i32, i32
  }
}

</mosaic_0001>

<bundles_post_ra>
// kernel: tpu_custom_call.1
= control target key start
LH: loop header
LB: loop body
LE: loop exit
PB: predicated region body
PF: predicated region fallthrough
CT: control target
= control target key end

     0   :  { %10 = vsyncpa [#allocation3], 0  ;;  %s554_s0 = inlined_call_operand.hbm [shape: f32[8,128], index: 0, kind: input, shape index: {}]   ;;  %s555_s1 = inlined_call_operand.hbm [shape: f32[256,128], index: 1, kind: input, shape index: {}]   ;;  %s556_s2 = inlined_call_operand.hbm [shape: f32[4,128], index: 2, kind: input, shape index: {}]   ;;  %s557_s3 = inlined_call_operand.hbm [shape: f32[4,256], index: 3, kind: input, shape index: {}]   ;;  %s558_s4 = inlined_call_operand.hbm [shape: f32[4,256], index: 4, kind: input, shape index: {}]   ;;  %s559_s5 = inlined_call_operand.hbm [shape: f32[32,256], index: 5, kind: output, shape index: {}]  }
   0x1   :  { %11 = vsyncpa [#allocation6], 0 }
   0x2   :  { %12 = vsyncpa [#allocation9], 0  ;;  %s29_s20 = sshll.u32 %s555_s1, 4  ;;  %s30_s20 = int_to_ptr.hbm [resolvable:$true] %s29_s20 }
   0x3   :  { %13 = vsyncpa [#allocation4], 0  ;;  %s494_s21 = smov [#allocation5]   ;;  %s54_s25 = sshll.u32 %s557_s3, 4  ;;  %s55_s25 = int_to_ptr.hbm [resolvable:$true] %s54_s25 }
   0x4   :  { %s31_s22 = sshll.u32 %s494_s21, 4  ;;  %s495_s26 = smov 128   ;;  %s32_s22 = int_to_ptr.vmem [resolvable:$true] %s31_s22 }
   0x5   :  { %s496_s27 = smov 8   ;;  %s497_s28 = smov [#allocation8]  }
   0x6   :  { %37 = dma.hbm_to_vmem [thread:$0]  %s30_s20, 4096, %s32_s22, [#allocation6], %s495_s26, %s495_s26, %s496_s27  }
   0x7   :  { %s56_s29 = sshll.u32 %s497_s28, 4  ;;  %s19_s7 = sshll.u32 %s554_s0, 4  ;;  %s57_s29 = int_to_ptr.vmem [resolvable:$true] %s56_s29  ;;  %s20_s7 = int_to_ptr.hbm [resolvable:$true] %s19_s7 }
   0x8   :  { %59 = dma.hbm_to_vmem [thread:$0]  %s55_s25, 128, %s57_s29, [#allocation9]  }
   0x9   :  { %s43_s9 = sshll.u32 %s556_s2, 4  ;;  %s498_s10 = smov [#allocation2]   ;;  %s44_s9 = int_to_ptr.hbm [resolvable:$true] %s43_s9 }
   0xa   :  { %s21_s11 = sshll.u32 %s498_s10, 4  ;;  %s499_s3 = smov [#allocation7]   ;;  %s22_s11 = int_to_ptr.vmem [resolvable:$true] %s21_s11 }
   0xb   :  { %24 = dma.hbm_to_vmem [thread:$0]  %s20_s7, 128, %s22_s11, [#allocation3]  }
   0xc   :  { %s45_s12 = sshll.u32 %s499_s3, 4  ;;  %s65_s15 = sshll.u32 %s558_s4, 4  ;;  %s46_s12 = int_to_ptr.vmem [resolvable:$true] %s45_s12  ;;  %s66_s15 = int_to_ptr.hbm [resolvable:$true] %s65_s15 }
   0xd   :  { %48 = dma.hbm_to_vmem [thread:$0]  %s44_s9, 64, %s46_s12, [#allocation6]  }
   0xe   :  { %s500_s0 = smov [#allocation10]  }
   0xf   :  { %s67_s16 = sshll.u32 %s500_s0, 4  ;;  %s68_s16 = int_to_ptr.vmem [resolvable:$true] %s67_s16 }
  0x10   :  { %70 = dma.hbm_to_vmem [thread:$0]  %s66_s15, 128, %s68_s16, [#allocation9]  }
  0x11   :  { %486 = dma.done.wait [#allocation3], 128  }
  0x12   :  { %487 = vsyncadd [#allocation3], 4294967168 }
  0x13   :  { %488 = dma.done.wait [#allocation6], 4160  }
  0x14   :  { %489 = vsyncadd [#allocation6], 4294963136 }
  0x15   :  { %490 = dma.done.wait [#allocation9], 256  }
  0x16   :  { %491 = vsyncadd [#allocation9], 4294967040  ;;  %v124_v0 = vld [vmem:[#allocation5 + $0x78] sm:$0xff]  ;;  %v123_v2 = vld [vmem:[#allocation5 + $0x70] sm:$0xff]  ;;  %vm202_vm0 = vcmask 1040384   ;;  %vm207_vm1 = vcmask 1042434  }
  0x17   :  { %v140_v1 = vld [vmem:[#allocation5 + $0xf8] sm:$0xff]  ;;  %300 = vmatpush.xpose.msra.mxu2 %v124_v0  ;;  %v139_v3 = vld [vmem:[#allocation5 + $0xf0] sm:$0xff]  ;;  %141 = vmatpush.xpose.msra.mxu0 %v124_v0  ;;  %v122_v4 = vld [vmem:[#allocation5 + $0x68] sm:$0xff]  ;;  %vm204_vm2 = vcmask 1041409   ;;  %vm210_vm3 = vcmask 1043459   ;;  %s501_s2 = smov [#allocation11]  }
  0x18   :  { %316 = vmatpush.xpose.msra.mxu3 %v140_v1  ;;  %170 = vmatpush.xpose.msra.mxu1 %v140_v1  ;;  %v138_v5 = vld [vmem:[#allocation5 + $0xe8] sm:$0xff]  ;;  %v121_v6 = vld [vmem:[#allocation5 + $0x60] sm:$0xff]  ;;  %v120_v8 = vld [vmem:[#allocation5 + $0x58] sm:$0xff]  ;;  %s283_s4 = sshll.u32 %s501_s2, 4  ;;  %s285_s19 = sshll.u32 %s559_s5, 4  ;;  %s284_s4 = int_to_ptr.vmem [resolvable:$true] %s283_s4  ;;  %s286_s19 = int_to_ptr.hbm [resolvable:$true] %s285_s19 }
  0x19   :  { %v137_v7 = vld [vmem:[#allocation5 + $0xe0] sm:$0xff]  ;;  %v136_v9 = vld [vmem:[#allocation5 + $0xd8] sm:$0xff]  ;;  %v119_v10 = vld [vmem:[#allocation5 + $0x50] sm:$0xff]  ;;  %s502_s20 = smov 256   ;;  %s503_s21 = smov 16  }
  0x1a   :  { %v135_v11 = vld [vmem:[#allocation5 + $0xd0] sm:$0xff]  ;;  %v118_v12 = vld [vmem:[#allocation5 + $0x48] sm:$0xff]  ;;  %v117_v14 = vld [vmem:[#allocation5 + $0x40] sm:$0xff] }
  0x1b   :  { %301 = vmatpush.xpose.msra.mxu2 %v123_v2  ;;  %142 = vmatpush.xpose.msra.mxu0 %v123_v2  ;;  %v134_v13 = vld [vmem:[#allocation5 + $0xc8] sm:$0xff]  ;;  %v133_v15 = vld [vmem:[#allocation5 + $0xc0] sm:$0xff]  ;;  %v116_v16 = vld [vmem:[#allocation5 + $0x38] sm:$0xff] }
  0x1c   :  { %317 = vmatpush.xpose.msra.mxu3 %v139_v3  ;;  %171 = vmatpush.xpose.msra.mxu1 %v139_v3  ;;  %v132_v17 = vld [vmem:[#allocation5 + $0xb8] sm:$0xff]  ;;  %v115_v18 = vld [vmem:[#allocation5 + $0x30] sm:$0xff]  ;;  %v114_v20 = vld [vmem:[#allocation5 + $0x28] sm:$0xff] }
  0x1d   :  { %v131_v19 = vld [vmem:[#allocation5 + $0xb0] sm:$0xff]  ;;  %v130_v21 = vld [vmem:[#allocation5 + $0xa8] sm:$0xff]  ;;  %v113_v22 = vld [vmem:[#allocation5 + $0x20] sm:$0xff] }
  0x1e   :  { %v129_v23 = vld [vmem:[#allocation5 + $0xa0] sm:$0xff]  ;;  %v112_v24 = vld [vmem:[#allocation5 + $0x18] sm:$0xff]  ;;  %v111_v27 = vld [vmem:[#allocation5 + $0x10] sm:$0xff] }
  0x1f   :  { %302 = vmatpush.xpose.msra.mxu2 %v122_v4  ;;  %143 = vmatpush.xpose.msra.mxu0 %v122_v4  ;;  %v128_v25 = vld [vmem:[#allocation5 + $0x98] sm:$0xff]  ;;  %v92_v26 = vld [vmem:[#allocation7] sm:$0xf]  ;;  %v127_v28 = vld [vmem:[#allocation5 + $0x90] sm:$0xff] }
  0x20   :  { %318 = vmatpush.xpose.msra.mxu3 %v138_v5  ;;  %172 = vmatpush.xpose.msra.mxu1 %v138_v5  ;;  %v95_v29 = vrot.slane %v92_v26, 2  ;;  %v110_v30 = vld [vmem:[#allocation5 + $0x8] sm:$0xff]  ;;  %v91_v33 = vld [vmem:[#allocation2] sm:$0xff]  ;;  %v97_v34 = vperm.slane %v92_v26, 0  ;;  %v109_v35 = vld [vmem:[#allocation5] sm:$0xff]  ;;  %v96_v38 = vrot.slane %v92_v26, 3 }
  0x21   :  { %v126_v31 = vld [vmem:[#allocation5 + $0x88] sm:$0xff]  ;;  %v125_v36 = vld [vmem:[#allocation5 + $0x80] sm:$0xff]  ;;  %v94_v40 = vrot.slane %v92_v26, 1 }
  0x22   :  { %v99_v32 = vperm.slane %v95_v29, 0  ;;  %v105_v39 = vmul.f32 %v97_v34, %v91_v33  ;;  %v100_v41 = vperm.slane %v96_v38, 0  ;;  %v199_v45 = vld [vmem:[#allocation8] sm:$0xff]  ;;  %v213_v46 = vld [vmem:[#allocation10] sm:$0xff] }
  0x23   :  { %303 = vmatpush.xpose.msra.mxu2 %v121_v6  ;;  %144 = vmatpush.xpose.msra.mxu0 %v121_v6  ;;  %v98_v42 = vperm.slane %v94_v40, 0  ;;  %v201_v47 = vrot.slane %v199_v45, 3  ;;  %v215_v48 = vrot.slane %v213_v46, 3 }
  0x24   :  { %319 = vmatpush.xpose.msra.mxu3 %v137_v7  ;;  %173 = vmatpush.xpose.msra.mxu1 %v137_v7  ;;  %v107_v37 = vmul.f32 %v99_v32, %v91_v33  ;;  %v108_v43 = vmul.f32 %v100_v41, %v91_v33 }
  0x25   :  { %v106_v44 = vmul.f32 %v98_v42, %v91_v33  ;;  %v203_v49 = vsel %vm202_vm0, %v199_v45, %v201_v47  ;;  %v208_v50 = vsel %vm207_vm1, %v199_v45, %v201_v47  ;;  %v216_v51 = vsel %vm202_vm0, %v213_v46, %v215_v48 }
  0x26   :  { %v223_v52 = vperm.slane %v203_v49, 0  ;;  %v219_v53 = vsel %vm207_vm1, %v213_v46, %v215_v48  ;;  %v224_v54 = vperm.slane %v203_v49, 1  ;;  %v209_v55 = vrot.slane %v208_v50, 2 }
  0x27   :  { %304 = vmatpush.xpose.msra.mxu2 %v120_v8  ;;  %145 = vmatpush.xpose.msra.mxu0 %v120_v8  ;;  %v205_v56 = vsel %vm204_vm2, %v199_v45, %v201_v47  ;;  %v247_v57 = vperm.slane %v216_v51, 0  ;;  %v248_v58 = vperm.slane %v216_v51, 1  ;;  %v220_v60 = vrot.slane %v219_v53, 2 }
  0x28   :  { %320 = vmatpush.xpose.msra.mxu3 %v136_v9  ;;  %174 = vmatpush.xpose.msra.mxu1 %v136_v9  ;;  %v217_v62 = vsel %vm204_vm2, %v213_v46, %v215_v48  ;;  %v206_v1 = vrot.slane %v205_v56, 1  ;;  %v227_v2 = vperm.slane %v209_v55, 0  ;;  %v228_v3 = vperm.slane %v209_v55, 1 }
  0x29   :  { %v218_v6 = vrot.slane %v217_v62, 1  ;;  %v211_v7 = vsel %vm210_vm3, %v199_v45, %v201_v47  ;;  %v251_v8 = vperm.slane %v220_v60, 0  ;;  %v252_v9 = vperm.slane %v220_v60, 1 }
  0x2b   :  { %305 = vmatpush.xpose.msra.mxu2 %v119_v10  ;;  %146 = vmatpush.xpose.msra.mxu0 %v119_v10 }
  0x2c   :  { %321 = vmatpush.xpose.msra.mxu3 %v135_v11  ;;  %175 = vmatpush.xpose.msra.mxu1 %v135_v11 }
  0x2f   :  { %306 = vmatpush.xpose.msra.mxu2 %v118_v12  ;;  %147 = vmatpush.xpose.msra.mxu0 %v118_v12  ;;  %v225_v12 = vperm.slane %v206_v1, 0 }
  0x30   :  { %322 = vmatpush.xpose.msra.mxu3 %v134_v13  ;;  %176 = vmatpush.xpose.msra.mxu1 %v134_v13  ;;  %v221_v13 = vsel %vm210_vm3, %v213_v46, %v215_v48 }
  0x33   :  { %307 = vmatpush.xpose.msra.mxu2 %v117_v14  ;;  %148 = vmatpush.xpose.msra.mxu0 %v117_v14  ;;  %v226_v14 = vperm.slane %v206_v1, 1 }
  0x34   :  { %323 = vmatpush.xpose.msra.mxu3 %v133_v15  ;;  %177 = vmatpush.xpose.msra.mxu1 %v133_v15 }
  0x37   :  { %308 = vmatpush.xpose.msra.mxu2 %v116_v16  ;;  %149 = vmatpush.xpose.msra.mxu0 %v116_v16 }
  0x38   :  { %324 = vmatpush.xpose.msra.mxu3 %v132_v17  ;;  %178 = vmatpush.xpose.msra.mxu1 %v132_v17  ;;  %v212_v17 = vrot.slane %v211_v7, 3 }
  0x3b   :  { %309 = vmatpush.xpose.msra.mxu2 %v115_v18  ;;  %150 = vmatpush.xpose.msra.mxu0 %v115_v18  ;;  %v249_v18 = vperm.slane %v218_v6, 0 }
  0x3c   :  { %325 = vmatpush.xpose.msra.mxu3 %v131_v19  ;;  %179 = vmatpush.xpose.msra.mxu1 %v131_v19  ;;  %v250_v19 = vperm.slane %v218_v6, 1 }
  0x3f   :  { %310 = vmatpush.xpose.msra.mxu2 %v114_v20  ;;  %151 = vmatpush.xpose.msra.mxu0 %v114_v20 }
  0x40   :  { %326 = vmatpush.xpose.msra.mxu3 %v130_v21  ;;  %180 = vmatpush.xpose.msra.mxu1 %v130_v21 }
  0x43   :  { %311 = vmatpush.xpose.msra.mxu2 %v113_v22  ;;  %152 = vmatpush.xpose.msra.mxu0 %v113_v22 }
  0x44   :  { %327 = vmatpush.xpose.msra.mxu3 %v129_v23  ;;  %181 = vmatpush.xpose.msra.mxu1 %v129_v23  ;;  %v222_v23 = vrot.slane %v221_v13, 3 }
  0x46   :  { %v254_v32 = vperm.slane %v222_v23, 1 }
  0x47   :  { %312 = vmatpush.xpose.msra.mxu2 %v112_v24  ;;  %153 = vmatpush.xpose.msra.mxu0 %v112_v24 }
  0x48   :  { %328 = vmatpush.xpose.msra.mxu3 %v128_v25  ;;  %182 = vmatpush.xpose.msra.mxu1 %v128_v25 }
  0x4b   :  { %313 = vmatpush.xpose.msra.mxu2 %v111_v27  ;;  %154 = vmatpush.xpose.msra.mxu0 %v111_v27  ;;  %v229_v27 = vperm.slane %v212_v17, 0 }
  0x4c   :  { %329 = vmatpush.xpose.msra.mxu3 %v127_v28  ;;  %183 = vmatpush.xpose.msra.mxu1 %v127_v28  ;;  %v230_v28 = vperm.slane %v212_v17, 1 }
  0x4f   :  { %314 = vmatpush.xpose.msra.mxu2 %v110_v30  ;;  %155 = vmatpush.xpose.msra.mxu0 %v110_v30 }
  0x50   :  { %330 = vmatpush.xpose.msra.mxu3 %v126_v31  ;;  %184 = vmatpush.xpose.msra.mxu1 %v126_v31  ;;  %v253_v31 = vperm.slane %v222_v23, 0 }
  0x53   :  { %315 = vmatpush.xpose.msra.mxu2 %v109_v35  ;;  %156 = vmatpush.xpose.msra.mxu0 %v109_v35 }
  0x54   :  { %331 = vmatpush.xpose.msra.mxu3 %v125_v36  ;;  %185 = vmatpush.xpose.msra.mxu1 %v125_v36 }
  0x56   :  { %163 = vmatmul.f32.vlgmr.msra.gmra.mxu2 %v107_v37  ;;  %157 = vmatmul.f32.vlgmr.msra.gmra.mxu0 %v105_v39 }
  0x57   :  { %192 = vmatmul.f32.vlgmr.msra.gmra.mxu3 %v107_v37  ;;  %186 = vmatmul.f32.vlgmr.msra.gmra.mxu1 %v105_v39 }
  0x5e   :  { %166 = vmatmul.f32.gmra.mxu2 %v108_v43  ;;  %160 = vmatmul.f32.gmra.mxu0 %v106_v44 }
  0x5f   :  { %195 = vmatmul.f32.gmra.mxu3 %v108_v43  ;;  %189 = vmatmul.f32.gmra.mxu1 %v106_v44 }
  0xd3   :  { %v158_v59 = vpop.f32.mrf.mxu0 }
  0xd4   :  { %v187_v61 = vpop.f32.mrf.mxu1  ;;  %v239_v63 = vmul.f32 %v223_v52, %v158_v59 }
  0xd5   :  { %v240_v0 = vmul.f32 %v224_v54, %v187_v61 }
  0xd6   :  { %v263_v4 = vadd.f32 %v247_v57, %v239_v63 }
  0xd7   :  { %v264_v5 = vadd.f32 %v248_v58, %v240_v0 }
  0xd8   :  { %271 = vst [vmem:[#allocation11] sm:$0xff] %v263_v4 }
  0xd9   :  { %v164_v10 = vpop.f32.mrf.mxu2  ;;  %272 = vst [vmem:[#allocation11 + $0x8] sm:$0xff] %v264_v5 }
  0xda   :  { %v193_v11 = vpop.f32.mrf.mxu3  ;;  %v243_v15 = vmul.f32 %v227_v2, %v164_v10 }
  0xdb   :  { %v244_v16 = vmul.f32 %v228_v3, %v193_v11  ;;  %v161_v22 = vpop.f32.mrf.mxu0 }
  0xdc   :  { %v267_v20 = vadd.f32 %v251_v8, %v243_v15  ;;  %v190_v24 = vpop.f32.mrf.mxu1  ;;  %v241_v25 = vmul.f32 %v225_v12, %v161_v22 }
  0xdd   :  { %v268_v21 = vadd.f32 %v252_v9, %v244_v16  ;;  %v242_v26 = vmul.f32 %v226_v14, %v190_v24 }
  0xde   :  { %275 = vst [vmem:[#allocation11 + $0x20] sm:$0xff] %v267_v20  ;;  %v265_v29 = vadd.f32 %v249_v18, %v241_v25 }
  0xdf   :  { %276 = vst [vmem:[#allocation11 + $0x28] sm:$0xff] %v268_v21  ;;  %v266_v30 = vadd.f32 %v250_v19, %v242_v26 }
  0xe0   :  { %273 = vst [vmem:[#allocation11 + $0x10] sm:$0xff] %v265_v29 }
  0xe1   :  { %v167_v33 = vpop.f32.mrf.mxu2  ;;  %274 = vst [vmem:[#allocation11 + $0x18] sm:$0xff] %v266_v30 }
  0xe2   :  { %v196_v34 = vpop.f32.mrf.mxu3  ;;  %v245_v35 = vmul.f32 %v229_v27, %v167_v33 }
  0xe3   :  { %v246_v36 = vmul.f32 %v230_v28, %v196_v34 }
  0xe4   :  { %v269_v37 = vadd.f32 %v253_v31, %v245_v35 }
  0xe5   :  { %v270_v38 = vadd.f32 %v254_v32, %v246_v36 }
  0xe6   :  { %277 = vst [vmem:[#allocation11 + $0x30] sm:$0xff] %v269_v37 }
  0xe7   :  { %278 = vst [vmem:[#allocation11 + $0x38] sm:$0xff] %v270_v38 }
  0xe8   :  { %291 = dma.vmem_to_hbm [thread:$0]  %s284_s4, 1024, %s286_s19, [#allocation4], %s502_s20, %s502_s20, %s503_s21  }
  0xe9   :  { %492 = dma.done.wait [#allocation4], 1024  }
  0xea   :  { %493 = vsyncadd [#allocation4], 4294966272 }
  0xeb   :  { %296 = vsyncpa [#allocation3], 1 }
  0xec   :  { %297 = vsyncpa [#allocation6], 1 }
  0xed   :  { %298 = vsyncpa [#allocation9], 1 }
  0xee   :  { %299 = vsyncpa [#allocation4], 1 }

</bundles_post_ra>
